<compile_context>
chip_gen: v7x
topology: tpu7x:2x2x1
jax: 0.10.0
libtpu: 0.0.40
codegen_flags: <defaults>
</compile_context>

<pallas_src>
import jax
import jax.numpy as jnp
from jax.experimental import pallas as pl
from jax.experimental.pallas import tpu as pltpu


def _round_up(x, m):
    return (x + m - 1) // m * m


def _disc_kernel(x_ref, w1_ref, b1_ref, w2_ref, b2_ref, w3_ref, b3_ref, o_ref):
    # Hidden layer 1: MXU matmul (f32 accumulate) + bias + ReLU (f32 on the VPU).
    h = jnp.dot(x_ref[...], w1_ref[...], preferred_element_type=jnp.float32)
    h = jnp.maximum(h + b1_ref[...], 0.0)
    # Hidden layer 2.
    h = jnp.dot(h.astype(w2_ref.dtype), w2_ref[...], preferred_element_type=jnp.float32)
    h = jnp.maximum(h + b2_ref[...], 0.0)
    # Output head (out_features == 1): keep it off the MXU.  VPU multiply against the
    # (1, H2) w3 row + XLU lane reduce, then add the SMEM scalar bias.
    logits = jnp.sum(h * w3_ref[...], axis=-1, keepdims=True) + b3_ref[0]
    o_ref[...] = logits.astype(o_ref.dtype)


def discriminator_forward(x, params, *, tile_b=None, compute_dtype=jnp.bfloat16):
    """x: (B, input_size) float32.  params: dict of (in,out) weights and (1,out) biases.
    Returns (B,) float32 logits, matching Discriminator.forward's squeeze(dim=-1)."""
    B, F = x.shape

    # ---- batch tiling (amortize per-step overhead, enable pipelining / megacore) ----
    if tile_b is None:
        tile_b = min(512, _round_up(B, 16))          # <=512 keeps vreg pressure sane
    tile_b = max(16, _round_up(int(tile_b), 16))     # sublane/bf16-pack friendly
    b_pad = _round_up(B, tile_b)

    # ---- dtype plumbing: bf16 inputs/weights for the two MXU layers, f32 elsewhere ----
    x_c = x.astype(compute_dtype)
    if b_pad != B:
        x_c = jnp.pad(x_c, ((0, b_pad - B), (0, 0)))

    w1 = params["w1"].astype(compute_dtype)
    w2 = params["w2"].astype(compute_dtype)
    b1 = params["b1"].astype(jnp.float32)            # (1, H1)
    b2 = params["b2"].astype(jnp.float32)            # (1, H2)
    w3 = params["w3"].astype(jnp.float32).reshape(1, -1)   # (1, H2) row for the VPU head
    b3 = params["b3"].astype(jnp.float32).reshape(-1)[:1]  # (1,) scalar -> SMEM

    grid = (b_pad // tile_b,)
    full = lambda shape: pl.BlockSpec(shape, lambda i: (0, 0))

    out = pl.pallas_call(
        _disc_kernel,
        out_shape=jax.ShapeDtypeStruct((b_pad, 1), jnp.float32),
        grid_spec=pltpu.PrefetchScalarGridSpec(
            num_scalar_prefetch=0,
            grid=grid,
            in_specs=[
                pl.BlockSpec((tile_b, F), lambda i: (i, 0)),   # x tile (pipelined)
                full(w1.shape), full(b1.shape),                # resident weights
                full(w2.shape), full(b2.shape),
                full(w3.shape),
                pl.BlockSpec(memory_space=pltpu.MemorySpace.SMEM),  # b3 scalar
            ],
            out_specs=pl.BlockSpec((tile_b, 1), lambda i: (i, 0)),
        ),
        compiler_params=pltpu.CompilerParams(
            dimension_semantics=("parallel",),
        ),
    )(x_c, w1, b1, w2, b2, w3, b3)

    # squeeze(dim=-1) + drop padding rows (outside the kernel).
    return out[:B, 0]


def init_params(key, input_size, hidden_sizes):
    """Deterministic synthetic init (Glorot-ish uniform), layers:
    input_size -> hidden_sizes[0] -> hidden_sizes[1] -> 1."""
    dims = [input_size] + list(hidden_sizes) + [1]
    names = ["1", "2", "3"]
    params = {}
    for name, (din, dout) in zip(names, zip(dims[:-1], dims[1:])):
        key, kw, kb = jax.random.split(key, 3)
        scale = (6.0 / (din + dout)) ** 0.5
        params[f"w{name}"] = jax.random.uniform(
            kw, (din, dout), jnp.float32, minval=-scale, maxval=scale
        )
        params[f"b{name}"] = jax.random.uniform(
            kb, (1, dout), jnp.float32, minval=-scale, maxval=scale
        )
    return params


def _reference_forward(x, params, compute_dtype=jnp.float32):
    """Pure-JAX reference mirroring the kernel's dtype casts (f32 accumulation)."""
    w1 = params["w1"].astype(compute_dtype)
    w2 = params["w2"].astype(compute_dtype)
    h = jnp.dot(x.astype(compute_dtype), w1, preferred_element_type=jnp.float32)
    h = jnp.maximum(h + params["b1"], 0.0)
    h = jnp.dot(h.astype(compute_dtype), w2, preferred_element_type=jnp.float32)
    h = jnp.maximum(h + params["b2"], 0.0)
    return jnp.sum(h * params["w3"][:, 0][None, :], axis=-1) + params["b3"][0, 0]


if __name__ == "__main__":
    input_size = 32
    hidden_sizes = [64, 32]

    key = jax.random.PRNGKey(0)
    key, kx1, kx2 = jax.random.split(key, 3)
    params = init_params(key, input_size, hidden_sizes)

    # 1) f32 path, ragged batch + explicit small tile (exercises padding + multi-step grid).
    batch1 = 40
    x1 = jax.random.normal(kx1, (batch1, input_size), jnp.float32)
    y1 = discriminator_forward(x1, params, tile_b=16, compute_dtype=jnp.float32)
    y1 = jax.block_until_ready(y1)
    y1_ref = _reference_forward(x1, params, jnp.float32)
    assert y1.shape == (batch1,)
    assert jnp.allclose(y1, y1_ref, atol=1e-4, rtol=1e-4)

    # 2) default path (bf16 inputs/weights, f32 accumulation, auto tile).
    batch2 = 64
    x2 = jax.random.normal(kx2, (batch2, input_size), jnp.float32)
    y2 = discriminator_forward(x2, params)
    y2 = jax.block_until_ready(y2)
    y2_ref = _reference_forward(x2, params, jnp.bfloat16)
    assert y2.shape == (batch2,)
    assert jnp.allclose(y2, y2_ref, atol=1e-3, rtol=1e-3)

    print("KERNEL_OK")
</pallas_src>

<mosaic_0001>
module attributes {stable_mosaic.version = 11 : i64} {
  func.func @_disc_kernel(%arg0: i32, %arg1: memref<16x32xf32, #tpu.memory_space<vmem>>, %arg2: memref<32x64xf32, #tpu.memory_space<vmem>>, %arg3: memref<1x64xf32, #tpu.memory_space<vmem>>, %arg4: memref<64x32xf32, #tpu.memory_space<vmem>>, %arg5: memref<1x32xf32, #tpu.memory_space<vmem>>, %arg6: memref<1x32xf32, #tpu.memory_space<vmem>>, %arg7: memref<1xf32, #tpu.memory_space<smem>>, %arg8: memref<16x1xf32, #tpu.memory_space<vmem>>) attributes {dimension_semantics = [#tpu.dimension_semantics<parallel>], iteration_bounds = array<i64: 3>, scalar_prefetch = 0 : i64, scratch_operands = 0 : i64, tpu.core_type = #tpu.core_type<tc>, window_params = [{transform_indices = @transform_0, window_bounds = array<i64: 16, 32>}, {pipeline_mode = #tpu.pipeline_mode<synchronous>, transform_indices = @transform_1, window_bounds = array<i64: 32, 64>}, {pipeline_mode = #tpu.pipeline_mode<synchronous>, transform_indices = @transform_2, window_bounds = array<i64: 1, 64>}, {pipeline_mode = #tpu.pipeline_mode<synchronous>, transform_indices = @transform_3, window_bounds = array<i64: 64, 32>}, {pipeline_mode = #tpu.pipeline_mode<synchronous>, transform_indices = @transform_4, window_bounds = array<i64: 1, 32>}, {pipeline_mode = #tpu.pipeline_mode<synchronous>, transform_indices = @transform_5, window_bounds = array<i64: 1, 32>}, {transform_indices = @transform_6, window_bounds = array<i64: 1>}, {transform_indices = @transform_7, window_bounds = array<i64: 16, 1>}]} {
    %c0 = arith.constant 0 : index
    %c0_0 = arith.constant 0 : index
    %0 = vector.load %arg1[%c0, %c0_0] : memref<16x32xf32, #tpu.memory_space<vmem>>, vector<16x32xf32>
    %c0_1 = arith.constant 0 : index
    %c0_2 = arith.constant 0 : index
    %1 = vector.load %arg2[%c0_1, %c0_2] : memref<32x64xf32, #tpu.memory_space<vmem>>, vector<32x64xf32>
    %cst = arith.constant dense<0.000000e+00> : vector<16x64xf32>
    %2 = tpu.matmul %0, %1, %cst {dimension_numbers = #tpu.dot_dimension_numbers<[1], [0], [0], [1], [0, 0, 1, 1], [], []>} : vector<16x32xf32>, vector<32x64xf32>, vector<16x64xf32> -> vector<16x64xf32>
    %c0_3 = arith.constant 0 : index
    %c0_4 = arith.constant 0 : index
    %3 = vector.load %arg3[%c0_3, %c0_4] : memref<1x64xf32, #tpu.memory_space<vmem>>, vector<1x64xf32>
    %4 = vector.broadcast %3 : vector<1x64xf32> to vector<16x64xf32>
    %5 = arith.addf %2, %4 : vector<16x64xf32>
    %cst_5 = arith.constant 0.000000e+00 : f32
    %6 = vector.broadcast %cst_5 : f32 to vector<16x64xf32>
    %7 = arith.maximumf %5, %6 : vector<16x64xf32>
    %c0_6 = arith.constant 0 : index
    %c0_7 = arith.constant 0 : index
    %8 = vector.load %arg4[%c0_6, %c0_7] : memref<64x32xf32, #tpu.memory_space<vmem>>, vector<64x32xf32>
    %cst_8 = arith.constant dense<0.000000e+00> : vector<16x32xf32>
    %9 = tpu.matmul %7, %8, %cst_8 {dimension_numbers = #tpu.dot_dimension_numbers<[1], [0], [0], [1], [0, 0, 1, 1], [], []>} : vector<16x64xf32>, vector<64x32xf32>, vector<16x32xf32> -> vector<16x32xf32>
    %c0_9 = arith.constant 0 : index
    %c0_10 = arith.constant 0 : index
    %10 = vector.load %arg5[%c0_9, %c0_10] : memref<1x32xf32, #tpu.memory_space<vmem>>, vector<1x32xf32>
    %11 = vector.broadcast %10 : vector<1x32xf32> to vector<16x32xf32>
    %12 = arith.addf %9, %11 : vector<16x32xf32>
    %cst_11 = arith.constant 0.000000e+00 : f32
    %13 = vector.broadcast %cst_11 : f32 to vector<16x32xf32>
    %14 = arith.maximumf %12, %13 : vector<16x32xf32>
    %c0_12 = arith.constant 0 : index
    %c0_13 = arith.constant 0 : index
    %15 = vector.load %arg6[%c0_12, %c0_13] : memref<1x32xf32, #tpu.memory_space<vmem>>, vector<1x32xf32>
    %16 = vector.broadcast %15 : vector<1x32xf32> to vector<16x32xf32>
    %17 = arith.mulf %14, %16 : vector<16x32xf32>
    %cst_14 = arith.constant dense<0.000000e+00> : vector<16xf32>
    %18 = vector.multi_reduction <add>, %17, %cst_14 [1] : vector<16x32xf32> to vector<16xf32>
    %19 = vector.shape_cast %18 : vector<16xf32> to vector<16x1xf32>
    %c0_15 = arith.constant 0 : index
    %20 = memref.load %arg7[%c0_15] : memref<1xf32, #tpu.memory_space<smem>>
    %21 = vector.broadcast %20 : f32 to vector<16x1xf32>
    %22 = arith.addf %19, %21 : vector<16x1xf32>
    %c0_16 = arith.constant 0 : index
    %c0_17 = arith.constant 0 : index
    %23 = vector.load %arg8[%c0_16, %c0_17] : memref<16x1xf32, #tpu.memory_space<vmem>>, vector<16x1xf32>
    tpu.vector_store %arg8[%c0_16, %c0_17], %22 {strides = array<i32>} : memref<16x1xf32, #tpu.memory_space<vmem>>, vector<16x1xf32>,
    return
  }
  func.func @transform_0(%arg0: i32) -> (i32, i32) {
    %c0_i32 = arith.constant 0 : i32
    %c0_i32_0 = arith.constant 0 : i32
    return %arg0, %c0_i32 : i32, i32
  }
  func.func @transform_1(%arg0: i32) -> (i32, i32) {
    %c0_i32 = arith.constant 0 : i32
    %c0_i32_0 = arith.constant 0 : i32
    %c0_i32_1 = arith.constant 0 : i32
    return %c0_i32, %c0_i32_0 : i32, i32
  }
  func.func @transform_2(%arg0: i32) -> (i32, i32) {
    %c0_i32 = arith.constant 0 : i32
    %c0_i32_0 = arith.constant 0 : i32
    %c0_i32_1 = arith.constant 0 : i32
    return %c0_i32, %c0_i32_0 : i32, i32
  }
  func.func @transform_3(%arg0: i32) -> (i32, i32) {
    %c0_i32 = arith.constant 0 : i32
    %c0_i32_0 = arith.constant 0 : i32
    %c0_i32_1 = arith.constant 0 : i32
    return %c0_i32, %c0_i32_0 : i32, i32
  }
  func.func @transform_4(%arg0: i32) -> (i32, i32) {
    %c0_i32 = arith.constant 0 : i32
    %c0_i32_0 = arith.constant 0 : i32
    %c0_i32_1 = arith.constant 0 : i32
    return %c0_i32, %c0_i32_0 : i32, i32
  }
  func.func @transform_5(%arg0: i32) -> (i32, i32) {
    %c0_i32 = arith.constant 0 : i32
    %c0_i32_0 = arith.constant 0 : i32
    %c0_i32_1 = arith.constant 0 : i32
    return %c0_i32, %c0_i32_0 : i32, i32
  }
  func.func @transform_6(%arg0: i32) -> i32 {
    %c0_i32 = arith.constant 0 : i32
    %c0_i32_0 = arith.constant 0 : i32
    return %c0_i32 : i32
  }
  func.func @transform_7(%arg0: i32) -> (i32, i32) {
    %c0_i32 = arith.constant 0 : i32
    %c0_i32_0 = arith.constant 0 : i32
    return %arg0, %c0_i32 : i32, i32
  }
}

</mosaic_0001>

<bundles_post_ra>
// kernel: tpu_custom_call.1
= control target key start
LH: loop header
LB: loop body
LE: loop exit
PB: predicated region body
PF: predicated region fallthrough
CT: control target
= control target key end

     0   :  { %s704_s26 = smov 0   ;;  %s777_s0 = inlined_call_operand.vmem [shape: f32[48,32], index: 0, kind: input, shape index: {}]   ;;  %s778_s1 = inlined_call_operand.vmem [shape: f32[32,64], index: 1, kind: input, shape index: {}]   ;;  %s779_s2 = inlined_call_operand.vmem [shape: f32[1,64], index: 2, kind: input, shape index: {}]   ;;  %s780_s3 = inlined_call_operand.vmem [shape: f32[64,32], index: 3, kind: input, shape index: {}]   ;;  %s781_s4 = inlined_call_operand.vmem [shape: f32[1,32], index: 4, kind: input, shape index: {}]   ;;  %s782_s5 = inlined_call_operand.vmem [shape: f32[1,32], index: 5, kind: input, shape index: {}]   ;;  %s783_s6 = inlined_call_operand.<no memory space> [shape: f32[1], index: 6, kind: input, shape index: {}]   ;;  %s784_s7 = inlined_call_operand.vmem [shape: f32[48,1], index: 7, kind: output, shape index: {}]  }
   0x1   :  { %12 = sst [smem:[#allocation2]] %s783_s6 }
   0x2 LB: > { %s557_s27 = sadd.s32 4294967295, %s659_s26   ;;  %p561_p0 = scmp.ge.s32.totalorder %s659_s26, 1  ;;  %s659_s26 = sphi %s704_s26, %s18_s26  }
   0x3   : > { %p239_p1 = scmp.lt.s32.totalorder %s659_s26, 4 }
   0x5   : > { %p240_p2 = pnand %p561_p0, %p239_p1 }
   0x6   : > { %v285_v0 = vld [vmem:[%s778_s1] sm:$0xff] (!%p240_p2)  ;;  %v286_v1 = vld [vmem:[%s778_s1 + $0x8] sm:$0xff] (!%p240_p2)  ;;  %v287_v2 = vld [vmem:[%s778_s1 + $0x10] sm:$0xff] (!%p240_p2)  ;;  %s562_s10 = sshll.u32 (!%p240_p2), %s557_s27, 1  ;;  %vm296_vm0 = vcmask (!%p240_p2), 261120   ;;  %vm395_vm1 = vcmask (!%p240_p2), 523264  }
   0x7   : > { %243 = sbr.rel (%p240_p2) target bundleno = 606 (0x25e), region = 48  ;;  %v621_v3 = vpack.c.bf16 (!%p240_p2), %v286_v1, %v285_v0  ;;  %v288_v4 = vld [vmem:[%s778_s1 + $0x18] sm:$0xff] (!%p240_p2)  ;;  %p272_p3 = scmp.lt.s32.totalorder (!%p240_p2), %s562_s10, 5  ;;  %v380_v5 = vld [vmem:[%s780_s3] sm:$0xff] (!%p240_p2)  ;;  %v381_v6 = vld [vmem:[%s780_s3 + $0x8] sm:$0xff] (!%p240_p2)  ;;  %vm498_vm2 = vcmask (!%p240_p2), 7168  }
   0x8   : > { %v625_v7 = vpack.c.bf16 (!%p240_p2), %v288_v4, %v287_v2  ;;  %v629_v8 = vpack.c.bf16 (!%p240_p2), %v381_v6, %v380_v5  ;;  %v382_v9 = vld [vmem:[%s780_s3 + $0x10] sm:$0xff] (!%p240_p2)  ;;  %v383_v10 = vld [vmem:[%s780_s3 + $0x18] sm:$0xff] (!%p240_p2)  ;;  %v384_v12 = vld [vmem:[%s780_s3 + $0x20] sm:$0xff] (!%p240_p2)  ;;  %s494_s17 = sld [smem:[#allocation2]] (!%p240_p2) }
   0x9   : > { %622 = vmatprep.subr.bf16.mxu0 (!%p240_p2), %v621_v3  ;;  %v633_v11 = vpack.c.bf16 (!%p240_p2), %v383_v10, %v382_v9  ;;  %v385_v13 = vld [vmem:[%s780_s3 + $0x28] sm:$0xff] (!%p240_p2)  ;;  %v386_v17 = vld [vmem:[%s780_s3 + $0x30] sm:$0xff] (!%p240_p2)  ;;  %v387_v18 = vld [vmem:[%s780_s3 + $0x38] sm:$0xff] (!%p240_p2) }
   0xa   : > { %624 = vmatpush3.bf16.msra.mxu0 (!%p240_p2), %v621_v3  ;;  %630 = vmatprep.subr.bf16.mxu1 (!%p240_p2), %v629_v8  ;;  %v637_v14 = vpack.c.bf16 (!%p240_p2), %v385_v13, %v384_v12  ;;  %v641_v19 = vpack.c.bf16 (!%p240_p2), %v387_v18, %v386_v17  ;;  %v566_v20 = vld [vmem:[%s779_s2] ss:$0 sm:$0xff] (!%p240_p2) }
   0xb   : > { %626 = vmatprep.subr.bf16.mxu0 (!%p240_p2), %v625_v7  ;;  %632 = vmatpush3.bf16.msra.mxu1 (!%p240_p2), %v629_v8  ;;  %v569_v27 = vld [vmem:[%s781_s4] ss:$0 sm:$0xff] (!%p240_p2) }
   0xc   : > { %634 = vmatprep.subr.bf16.mxu1 (!%p240_p2), %v633_v11  ;;  %v572_v32 = vld [vmem:[%s782_s5] ss:$0 sm:$0xff] (!%p240_p2) }
   0xe   : > { %s786_s10 = smov (!%p272_p3, %s562_s10), 5  ;;  %628 = vmatpush3.bf16.msra.mxu0 %v625_v7  ;;  %v495_v39 = vstv %s494_s17 }
   0xf   : > { %s563_s25 = sshll.u32 %s786_s10, 3  ;;  %636 = vmatpush3.bf16.msra.mxu1 %v633_v11 }
  0x10   : > { %s275_s29 = scalar_lea.vmem %s777_s0, %s563_s25  ;;  %638 = vmatprep.subr.bf16.mxu1 %v637_v14  ;;  %s281_s20 = scalar_lea.vmem %s784_s7, %s563_s25 }
  0x11   : > { %v283_v15 = vld [vmem:[%s275_s29] sm:$0xff]  ;;  %v284_v16 = vld [vmem:[%s275_s29 + $0x8] sm:$0xff] }
  0x12   : > { %599 = vmatprep.mubr.msk.f32.mxu0 %vm296_vm0, %v283_v15 }
  0x13   : > { %600 = vmatmul.mubr.msk.f32.vlgmr.msra.gmra.mrb[0].mxu0 %vm296_vm0, %v284_v16  ;;  %640 = vmatpush3.bf16.msra.mxu1 %v637_v14 }
  0x14   : > { %642 = vmatprep.subr.bf16.mxu1 %v641_v19 }
  0x17   : > { %644 = vmatpush3.bf16.msra.mxu1 %v641_v19 }
  0xe6   : > { %v601_v21 = vpop.f32.mrb[0].mxu0 }
  0xe7   : > { %v375_v22 = vadd.f32 %v601_v21, %v566_v20  ;;  %v369_v23 = vpop.f32.mrb[1].mxu0 }
  0xe8   : > { %v370_v24 = vadd.f32 %v566_v20, %v369_v23 }
  0xe9   : > { %v379_v26 = vmax.f32 %v375_v22, 0.0 }
  0xea   : > { %v378_v25 = vmax.f32 %v370_v24, 0.0 }
  0xec   : > { %618 = vmatprep.mubr.msk.f32.mxu1 %vm395_vm1, %v378_v25 }
  0xed   : > { %619 = vmatmul.mubr.msk.f32.vlgmr.msra.gmra.mrb[0].mxu1 %vm395_vm1, %v379_v26 }
 0x1c0   : > { %v620_v28 = vpop.f32.mrb[0].mxu1 }
 0x1c1   : > { %v474_v29 = vadd.f32 %v620_v28, %v569_v27  ;;  %v468_v30 = vpop.f32.mrb[1].mxu1 }
 0x1c2   : > { %v469_v31 = vadd.f32 %v569_v27, %v468_v30 }
 0x1c3   : > { %v478_v33 = vmax.f32 %v474_v29, 0.0 }
 0x1c4   : > { %v477_v34 = vmax.f32 %v469_v31, 0.0 }
 0x1c5   : > { %v487_v37 = vmul.f32 %v572_v32, %v478_v33 }
 0x1c6   : > { %v486_v35 = vmul.f32 %v572_v32, %v477_v34 }
 0x1c7   : > { %v491_v38 = vsel %vm296_vm0, %v487_v37, 0.0 }
 0x1c8   : > { %v488_v36 = vsel %vm296_vm0, %v486_v35, 0.0 }
 0x1c9   : > { %489 = vadd.xlane.f32.xlu0 %v488_v36 }
 0x1cd   : > { %492 = vadd.xlane.f32.xlu0 %v491_v38 }
 0x256   : > { %v490_v40 = vpop.xlane.xlu0 %489 }
 0x257   : > { %v496_v41 = vadd.f32 %v495_v39, %v490_v40 }
 0x259   : > { %499 = vst.msk [vmem:[%s281_s20] sm:$0xff] %vm498_vm2, %v496_v41 }
 0x25a   : > { %v493_v42 = vpop.xlane.xlu0 %492 }
 0x25b   : > { %v497_v43 = vadd.f32 %v495_v39, %v493_v42 }
 0x25d   : > { %500 = vst.msk [vmem:[%s281_s20 + $0x8] sm:$0xff] %vm498_vm2, %v497_v43 }
 0x25e PF: > { %s18_s26 = sadd.s32 1, %s659_s26  }
 0x25f   : > { %p15_p4 = scmp.ge.s32.totalorder %s18_s26, 5  }
 0x261   :  { %17 = sbr.rel (!%p15_p4) target bundleno = 2 (0x2), region = 78 }

</bundles_post_ra>
